<compile_context>
chip_gen: v7x
topology: tpu7x:2x2x1
jax: 0.10.0
libtpu: 0.0.40
codegen_flags: <defaults>
</compile_context>

<pallas_src>
import functools

import jax
import jax.numpy as jnp
from jax.experimental import pallas as pl
from jax.experimental.pallas import tpu as pltpu


def _round_up(x, m):
    return (x + m - 1) // m * m


def _cdiv(a, b):
    return -(-a // b)


def _mlp_kernel(x_ref, w_ref, b_ref, o_ref, *, n_layers, d_in_pad, d_pad,
                d_out_pad, activate_last):
    """Fused MLP over one batch tile.

    w_ref: [n_layers, d_pad, d_pad] zero-padded weights (compute dtype).
    b_ref: [n_layers, 8, d_pad]     f32 biases on row 0, zero elsewhere.
    Zero padding is forward-exact: padded input columns hit zero weight rows,
    padded output lanes get zero weight columns + zero bias, and SiLU(0)=0.
    """
    compute_dtype = w_ref.dtype
    h = x_ref[...]                                   # (bm, d_in_pad)
    for i in range(n_layers):
        in_w = d_in_pad if i == 0 else d_pad
        out_w = d_out_pad if i == n_layers - 1 else d_pad
        w = w_ref[i, 0:in_w, 0:out_w]                # static, tile-aligned view
        b = b_ref[i, 0:1, 0:out_w]                   # (1, out_w) f32
        # MXU matmul in the compute dtype (bf16 fast path), f32 accumulate.
        h32 = jnp.dot(h, w, preferred_element_type=jnp.float32) + b
        if i < n_layers - 1 or activate_last:
            h32 = h32 * jax.nn.sigmoid(h32)          # SiLU in f32 (EUP sigmoid)
        if i == n_layers - 1:
            o_ref[...] = h32.astype(o_ref.dtype)     # single cast, direct store
        else:
            h = h32.astype(compute_dtype)


def _pack_mlp(layer_params, weight_dtype, activate_last):
    """Pack (W[D_in, D_out], b[D_out]) per layer into lane-aligned slabs."""
    n = len(layer_params)
    dims = [layer_params[0][0].shape[0]] + [w.shape[1] for w, _ in layer_params]
    d_pad = max(_round_up(d, 128) for d in dims)
    w_slab = jnp.zeros((n, d_pad, d_pad), weight_dtype)
    b_slab = jnp.zeros((n, 8, d_pad), jnp.float32)
    for i, (w, b) in enumerate(layer_params):
        d_in, d_out = w.shape
        w_slab = w_slab.at[i, :d_in, :d_out].set(w.astype(weight_dtype))
        b_slab = b_slab.at[i, 0, :d_out].set(jnp.reshape(b, (-1,)).astype(jnp.float32))
    return dict(w=w_slab, b=b_slab,
                d_in=dims[0], d_out=dims[-1], d_pad=d_pad,
                d_in_pad=_round_up(dims[0], 128),
                d_out_pad=_round_up(dims[-1], 128),
                activate_last=activate_last)


def prepare_classifier(params, weight_dtype=jnp.float32):
    """Pack parameters once (hoisted out of the per-forward path).

    params: list of (weight[D_in, D_out], bias[D_out]) per Linear layer,
    last entry being the output layer (weights pre-transposed from PyTorch).
    """
    return {
        # Full MLP: hidden layers (each followed by SiLU) + linear output layer.
        "full": _pack_mlp(params, weight_dtype, activate_last=False),
        # hidden_layer only (PyTorch's return_hidden path ends with SiLU).
        "hidden": _pack_mlp(params[:-1], weight_dtype, activate_last=True),
    }


def _mlp_forward(x, packed, *, batch_tile=512):
    w_slab, b_slab = packed["w"], packed["b"]
    n_layers, d_pad, _ = w_slab.shape
    d_in, d_out = packed["d_in"], packed["d_out"]
    d_in_pad, d_out_pad = packed["d_in_pad"], packed["d_out_pad"]
    activate_last = packed["activate_last"]

    compute_dtype = w_slab.dtype
    out_dtype = x.dtype
    batch = x.shape[0]

    row_mult = 16 if compute_dtype == jnp.bfloat16 else 8
    c_bytes = jnp.dtype(compute_dtype).itemsize
    o_bytes = jnp.dtype(out_dtype).itemsize

    # Pick batch tiles to (a) minimize padding, (b) feed both v7x TensorCores
    # when batch allows (>= 2 grid steps on the "parallel" axis).
    n_tiles = max(1, _cdiv(batch, batch_tile))
    if n_tiles < 2 and batch > row_mult:
        n_tiles = 2
    bm = _round_up(_cdiv(batch, n_tiles), row_mult)

    # VMEM residency estimate: single-buffered params + double-buffered
    # activation tiles + headroom.  Shrink bm to stay under a v7x-safe budget.
    param_bytes = w_slab.size * c_bytes + b_slab.size * 4
    def vmem_est(bm_):
        return (param_bytes
                + 2 * bm_ * d_in_pad * c_bytes
                + 2 * bm_ * d_out_pad * o_bytes
                + (2 << 20))
    budget = 56 << 20                       # v7x: 64 MiB per TensorCore
    while vmem_est(bm) > budget and bm > row_mult:
        bm = _round_up(max(bm // 2, row_mult), row_mult)
    # TODO(synk): if param_bytes alone exceeds the v7x per-core budget, stream
    # weights layer-by-layer (emit_pipeline over a pl.ANY weight ref) instead
    # of keeping the whole slab VMEM-resident.
    vmem_limit = int(min(max(vmem_est(bm), 32 << 20), 100 << 20))

    b_pad = _round_up(batch, bm)

    # Pad x only to the (lane-aligned) real input width, in the compute dtype.
    x_pad = (jnp.zeros((b_pad, d_in_pad), compute_dtype)
             .at[:batch, :d_in].set(x.astype(compute_dtype)))

    kernel = functools.partial(
        _mlp_kernel, n_layers=n_layers, d_in_pad=d_in_pad, d_pad=d_pad,
        d_out_pad=d_out_pad, activate_last=activate_last)

    out_pad = pl.pallas_call(
        kernel,
        out_shape=jax.ShapeDtypeStruct((b_pad, d_out_pad), out_dtype),
        grid=(b_pad // bm,),
        in_specs=[
            # Batch tile of activations (double-buffered by default).
            pl.BlockSpec((bm, d_in_pad), lambda i: (i, 0)),
            # Parameter slabs: constant block index + single buffer ->
            # VMEM-resident across all batch tiles, one DMA each, 1x footprint.
            pl.BlockSpec((n_layers, d_pad, d_pad), lambda i: (0, 0, 0),
                         pipeline_mode=pl.Buffered(1)),
            pl.BlockSpec((n_layers, 8, d_pad), lambda i: (0, 0, 0),
                         pipeline_mode=pl.Buffered(1)),
        ],
        out_specs=pl.BlockSpec((bm, d_out_pad), lambda i: (i, 0)),
        compiler_params=pltpu.CompilerParams(
            dimension_semantics=("parallel",),   # megacore on v7x
            vmem_limit_bytes=vmem_limit),
    )(x_pad, w_slab, b_slab)

    return out_pad[:batch, :d_out]


def classifier_forward(x, prepared, return_hidden: bool = False, *, batch_tile=512):
    packed = prepared["hidden" if return_hidden else "full"]
    return _mlp_forward(x, packed, batch_tile=batch_tile)


def init_params(key, input_dim, hidden_dims, output_dim, dtype=jnp.float32):
    """Deterministic synthetic init mimicking nn.Linear's U(-1/sqrt(in), 1/sqrt(in))."""
    dims = [input_dim] + list(hidden_dims) + [output_dim]
    params = []
    for d_in, d_out in zip(dims[:-1], dims[1:]):
        key, kw, kb = jax.random.split(key, 3)
        bound = 1.0 / jnp.sqrt(jnp.asarray(d_in, dtype))
        w = jax.random.uniform(kw, (d_in, d_out), dtype, -bound, bound)
        b = jax.random.uniform(kb, (d_out,), dtype, -bound, bound)
        params.append((w, b))
    return params


def _reference_forward(x, params, return_hidden: bool = False):
    layer_params = params[:-1] if return_hidden else params
    n = len(layer_params)
    h = x
    for i, (w, b) in enumerate(layer_params):
        h = h @ w + b
        if i < n - 1 or return_hidden:
            h = h * jax.nn.sigmoid(h)
    return h


if __name__ == "__main__":
    input_dim, hidden_dims, output_dim = 32, (64, 48), 8
    batch = 4

    key = jax.random.PRNGKey(0)
    key, kx = jax.random.split(key)
    x = jax.random.normal(kx, (batch, input_dim), jnp.float32)
    params = init_params(key, input_dim, hidden_dims, output_dim)

    # Pack parameters ONCE (hoisted out of the per-forward path).
    prepared = prepare_classifier(params)

    # Default forward path (full MLP).
    out = jax.block_until_ready(classifier_forward(x, prepared))
    ref = _reference_forward(x, params)
    assert out.shape == (batch, output_dim)
    assert jnp.allclose(out, ref, atol=1e-5, rtol=1e-5), "mismatch vs reference (forward)"

    # return_hidden path (hidden_layer output, final SiLU applied).
    hid = jax.block_until_ready(classifier_forward(x, prepared, return_hidden=True))
    hid_ref = _reference_forward(x, params, return_hidden=True)
    assert hid.shape == (batch, hidden_dims[-1])
    assert jnp.allclose(hid, hid_ref, atol=1e-5, rtol=1e-5), "mismatch vs reference (hidden)"

    # bf16 weight/activation fast path (v6e/v7x MXU), f32 accumulation inside.
    prepared_bf16 = prepare_classifier(params, weight_dtype=jnp.bfloat16)
    out_bf16 = jax.block_until_ready(classifier_forward(x, prepared_bf16))
    assert out_bf16.shape == (batch, output_dim)
    assert jnp.allclose(out_bf16.astype(jnp.float32), ref, atol=1e-1, rtol=1e-1), \
        "mismatch vs reference (bf16 fast path)"

    # TODO(synk): Classifier.embed (torch.load from a path) is host file I/O,
    # not a kernel concern; it reduces to classifier_forward(..., return_hidden=True).

    print("KERNEL_OK")
</pallas_src>

<mosaic_0001>
module attributes {stable_mosaic.version = 11 : i64} {
  func.func @_mlp_kernel(%arg0: i32, %arg1: memref<8x128xf32, #tpu.memory_space<vmem>>, %arg2: memref<3x128x128xf32, #tpu.memory_space<vmem>>, %arg3: memref<3x8x128xf32, #tpu.memory_space<vmem>>, %arg4: memref<8x128xf32, #tpu.memory_space<vmem>>) attributes {dimension_semantics = [#tpu.dimension_semantics<parallel>], iteration_bounds = array<i64: 1>, scalar_prefetch = 0 : i64, scratch_operands = 0 : i64, tpu.core_type = #tpu.core_type<tc>, window_params = [{transform_indices = @transform_0, window_bounds = array<i64: 8, 128>}, {pipeline_mode = #tpu.pipeline_mode<synchronous>, transform_indices = @transform_1, window_bounds = array<i64: 3, 128, 128>}, {pipeline_mode = #tpu.pipeline_mode<synchronous>, transform_indices = @transform_2, window_bounds = array<i64: 3, 8, 128>}, {transform_indices = @transform_3, window_bounds = array<i64: 8, 128>}]} {
    %c0 = arith.constant 0 : index
    %c0_0 = arith.constant 0 : index
    %0 = vector.load %arg1[%c0, %c0_0] : memref<8x128xf32, #tpu.memory_space<vmem>>, vector<8x128xf32>
    %c0_1 = arith.constant 0 : index
    %c0_2 = arith.constant 0 : index
    %c0_3 = arith.constant 0 : index
    %1 = vector.load %arg2[%c0_1, %c0_2, %c0_3] : memref<3x128x128xf32, #tpu.memory_space<vmem>>, vector<1x128x128xf32>
    %2 = vector.shape_cast %1 : vector<1x128x128xf32> to vector<128x128xf32>
    %c0_4 = arith.constant 0 : index
    %c0_5 = arith.constant 0 : index
    %c0_6 = arith.constant 0 : index
    %3 = vector.load %arg3[%c0_4, %c0_5, %c0_6] : memref<3x8x128xf32, #tpu.memory_space<vmem>>, vector<1x1x128xf32>
    %4 = vector.shape_cast %3 : vector<1x1x128xf32> to vector<1x128xf32>
    %cst = arith.constant dense<0.000000e+00> : vector<8x128xf32>
    %5 = tpu.matmul %0, %2, %cst {dimension_numbers = #tpu.dot_dimension_numbers<[1], [0], [0], [1], [0, 0, 1, 1], [], []>} : vector<8x128xf32>, vector<128x128xf32>, vector<8x128xf32> -> vector<8x128xf32>
    %6 = vector.broadcast %4 : vector<1x128xf32> to vector<8x128xf32>
    %7 = arith.addf %5, %6 : vector<8x128xf32>
    %8 = arith.negf %7 : vector<8x128xf32>
    %9 = math.exp %8 : vector<8x128xf32>
    %cst_7 = arith.constant 1.000000e+00 : f32
    %10 = vector.broadcast %cst_7 : f32 to vector<8x128xf32>
    %11 = arith.addf %10, %9 : vector<8x128xf32>
    %12 = arith.divf %10, %11 : vector<8x128xf32>
    %13 = arith.mulf %7, %12 : vector<8x128xf32>
    %c1 = arith.constant 1 : index
    %c0_8 = arith.constant 0 : index
    %c0_9 = arith.constant 0 : index
    %14 = vector.load %arg2[%c1, %c0_8, %c0_9] : memref<3x128x128xf32, #tpu.memory_space<vmem>>, vector<1x128x128xf32>
    %15 = vector.shape_cast %14 : vector<1x128x128xf32> to vector<128x128xf32>
    %c1_10 = arith.constant 1 : index
    %c0_11 = arith.constant 0 : index
    %c0_12 = arith.constant 0 : index
    %16 = vector.load %arg3[%c1_10, %c0_11, %c0_12] : memref<3x8x128xf32, #tpu.memory_space<vmem>>, vector<1x1x128xf32>
    %17 = vector.shape_cast %16 : vector<1x1x128xf32> to vector<1x128xf32>
    %cst_13 = arith.constant dense<0.000000e+00> : vector<8x128xf32>
    %18 = tpu.matmul %13, %15, %cst_13 {dimension_numbers = #tpu.dot_dimension_numbers<[1], [0], [0], [1], [0, 0, 1, 1], [], []>} : vector<8x128xf32>, vector<128x128xf32>, vector<8x128xf32> -> vector<8x128xf32>
    %19 = vector.broadcast %17 : vector<1x128xf32> to vector<8x128xf32>
    %20 = arith.addf %18, %19 : vector<8x128xf32>
    %21 = arith.negf %20 : vector<8x128xf32>
    %22 = math.exp %21 : vector<8x128xf32>
    %cst_14 = arith.constant 1.000000e+00 : f32
    %23 = vector.broadcast %cst_14 : f32 to vector<8x128xf32>
    %24 = arith.addf %23, %22 : vector<8x128xf32>
    %25 = arith.divf %23, %24 : vector<8x128xf32>
    %26 = arith.mulf %20, %25 : vector<8x128xf32>
    %c2 = arith.constant 2 : index
    %c0_15 = arith.constant 0 : index
    %c0_16 = arith.constant 0 : index
    %27 = vector.load %arg2[%c2, %c0_15, %c0_16] : memref<3x128x128xf32, #tpu.memory_space<vmem>>, vector<1x128x128xf32>
    %28 = vector.shape_cast %27 : vector<1x128x128xf32> to vector<128x128xf32>
    %c2_17 = arith.constant 2 : index
    %c0_18 = arith.constant 0 : index
    %c0_19 = arith.constant 0 : index
    %29 = vector.load %arg3[%c2_17, %c0_18, %c0_19] : memref<3x8x128xf32, #tpu.memory_space<vmem>>, vector<1x1x128xf32>
    %30 = vector.shape_cast %29 : vector<1x1x128xf32> to vector<1x128xf32>
    %cst_20 = arith.constant dense<0.000000e+00> : vector<8x128xf32>
    %31 = tpu.matmul %26, %28, %cst_20 {dimension_numbers = #tpu.dot_dimension_numbers<[1], [0], [0], [1], [0, 0, 1, 1], [], []>} : vector<8x128xf32>, vector<128x128xf32>, vector<8x128xf32> -> vector<8x128xf32>
    %32 = vector.broadcast %30 : vector<1x128xf32> to vector<8x128xf32>
    %33 = arith.addf %31, %32 : vector<8x128xf32>
    %c0_21 = arith.constant 0 : index
    %c0_22 = arith.constant 0 : index
    %34 = vector.load %arg4[%c0_21, %c0_22] : memref<8x128xf32, #tpu.memory_space<vmem>>, vector<8x128xf32>
    tpu.vector_store %arg4[%c0_21, %c0_22], %33 {strides = array<i32>} : memref<8x128xf32, #tpu.memory_space<vmem>>, vector<8x128xf32>,
    return
  }
  func.func @transform_0(%arg0: i32) -> (i32, i32) {
    %c0_i32 = arith.constant 0 : i32
    %c0_i32_0 = arith.constant 0 : i32
    return %arg0, %c0_i32 : i32, i32
  }
  func.func @transform_1(%arg0: i32) -> (i32, i32, i32) {
    %c0_i32 = arith.constant 0 : i32
    %c0_i32_0 = arith.constant 0 : i32
    %c0_i32_1 = arith.constant 0 : i32
    %c0_i32_2 = arith.constant 0 : i32
    return %c0_i32, %c0_i32_0, %c0_i32_1 : i32, i32, i32
  }
  func.func @transform_2(%arg0: i32) -> (i32, i32, i32) {
    %c0_i32 = arith.constant 0 : i32
    %c0_i32_0 = arith.constant 0 : i32
    %c0_i32_1 = arith.constant 0 : i32
    %c0_i32_2 = arith.constant 0 : i32
    return %c0_i32, %c0_i32_0, %c0_i32_1 : i32, i32, i32
  }
  func.func @transform_3(%arg0: i32) -> (i32, i32) {
    %c0_i32 = arith.constant 0 : i32
    %c0_i32_0 = arith.constant 0 : i32
    return %arg0, %c0_i32 : i32, i32
  }
}

</mosaic_0001>

<bundles_post_ra>
// kernel: tpu_custom_call.1
= control target key start
LH: loop header
LB: loop body
LE: loop exit
PB: predicated region body
PF: predicated region fallthrough
CT: control target
= control target key end

     0   :  { %8 = vsyncpa [#allocation3], 0  ;;  %s817_s0 = inlined_call_operand.hbm [shape: f32[8,128], index: 0, kind: input, shape index: {}]   ;;  %s818_s1 = inlined_call_operand.hbm [shape: f32[3,128,128], index: 1, kind: input, shape index: {}]   ;;  %s819_s2 = inlined_call_operand.hbm [shape: f32[3,8,128], index: 2, kind: input, shape index: {}]   ;;  %s820_s3 = inlined_call_operand.hbm [shape: f32[8,128], index: 3, kind: output, shape index: {}]  }
   0x1   :  { %9 = vsyncpa [#allocation6], 0 }
   0x2   :  { %10 = vsyncpa [#allocation4], 0  ;;  %s707_s12 = smov [#allocation5]   ;;  %s613_s16 = scalar_lea.hbm %s818_s1, 6144 }
   0x3   :  { %s26_s13 = sshll.u32 %s707_s12, 4  ;;  %p614_p0 = scmp.ne.s32.totalorder %s818_s1, %s613_s16  ;;  %s27_s13 = int_to_ptr.vmem [resolvable:$true] %s26_s13 }
   0x4   :  { %p617_p1 = scmp.lt.u32.totalorder %s613_s16, %s818_s1 }
   0x6   :  { %p619_p2 = pnand %p617_p1, %p614_p0 }
   0x8   :  { %622 = shalt.err (!%p619_p2)
}
   0x9   :  { %s623_s21 = scalar_lea.vmem %s27_s13, 6144  ;;  %p628_p4 = scmp.lt.s32.totalorder %s27_s13, %s27_s13 }
   0xa   :  { %p624_p3 = scmp.ne.s32.totalorder %s27_s13, %s623_s21  ;;  %p629_p5 = scmp.lt.s32.totalorder %s623_s21, %s623_s21 }
   0xc   :  { %p630_p6 = por %p629_p5, %p628_p4 }
   0xe   :  { %p631_p7 = pnand %p630_p6, %p624_p3 }
  0x10   :  { %634 = shalt.err (!%p631_p7)
}
  0x11   :  { %s708_s22 = smov 128   ;;  %s709_s23 = smov 8  }
  0x12   :  { %32 = dma.hbm_to_vmem [thread:$0]  %s818_s1, 6144, %s27_s13, [#allocation6], %s708_s22, %s708_s22, %s709_s23  }
  0x13   :  { %s710_s26 = smov [#allocation2]   ;;  %s711_s28 = smov [#allocation7]  }
  0x14   :  { %s17_s27 = sshll.u32 %s710_s26, 4  ;;  %s38_s29 = sshll.u32 %s711_s28, 4  ;;  %s18_s27 = int_to_ptr.vmem [resolvable:$true] %s17_s27  ;;  %s39_s29 = int_to_ptr.vmem [resolvable:$true] %s38_s29 }
  0x15   :  { %s635_s5 = scalar_lea.hbm %s817_s0, 128 }
  0x16   :  { %p636_p8 = scmp.ne.s32.totalorder %s817_s0, %s635_s5  ;;  %p639_p9 = scmp.lt.u32.totalorder %s635_s5, %s817_s0 }
  0x18   :  { %p641_p10 = pnand %p639_p9, %p636_p8 }
  0x1a   :  { %644 = shalt.err (!%p641_p10)
}
  0x1b   :  { %s645_s1 = scalar_lea.vmem %s18_s27, 128  ;;  %p650_p12 = scmp.lt.s32.totalorder %s18_s27, %s18_s27 }
  0x1c   :  { %p646_p11 = scmp.ne.s32.totalorder %s18_s27, %s645_s1  ;;  %p651_p13 = scmp.lt.s32.totalorder %s645_s1, %s645_s1 }
  0x1e   :  { %p652_p0 = por %p651_p13, %p650_p12 }
  0x20   :  { %p653_p1 = pnand %p652_p0, %p646_p11 }
  0x22   :  { %656 = shalt.err (!%p653_p1)
}
  0x23   :  { %20 = dma.hbm_to_vmem [thread:$0]  %s817_s0, 128, %s18_s27, [#allocation3]  }
  0x24   :  { %s657_s14 = scalar_lea.hbm %s819_s2, 384 }
  0x25   :  { %p658_p2 = scmp.ne.s32.totalorder %s819_s2, %s657_s14  ;;  %p661_p3 = scmp.lt.u32.totalorder %s657_s14, %s819_s2 }
  0x27   :  { %p663_p4 = pnand %p661_p3, %p658_p2 }
  0x29   :  { %666 = shalt.err (!%p663_p4)
}
  0x2a   :  { %s667_s19 = scalar_lea.vmem %s39_s29, 384  ;;  %p672_p6 = scmp.lt.s32.totalorder %s39_s29, %s39_s29 }
  0x2b   :  { %p668_p5 = scmp.ne.s32.totalorder %s39_s29, %s667_s19  ;;  %p673_p7 = scmp.lt.s32.totalorder %s667_s19, %s667_s19 }
  0x2d   :  { %p674_p8 = por %p673_p7, %p672_p6 }
  0x2f   :  { %p675_p9 = pnand %p674_p8, %p668_p5 }
  0x31   :  { %678 = shalt.err (!%p675_p9)
}
  0x32   :  { %44 = dma.hbm_to_vmem [thread:$0]  %s819_s2, 384, %s39_s29, [#allocation6], %s708_s22, %s708_s22, %s709_s23  }
  0x33   :  { %701 = dma.done.wait [#allocation3], 128  }
  0x34   :  { %702 = vsyncadd [#allocation3], 4294967168 }
  0x35   :  { %703 = dma.done.wait [#allocation6], 6528  }
  0x36   :  { %704 = vsyncadd [#allocation6], 4294960768  ;;  %v712_v0 = vmov 0.0|0.0   ;;  %vm713_vm0 = vmmov 0   ;;  %v714_v1 = vmov 0.0   ;;  %v55_v2 = vld [vmem:[#allocation5] sm:$0xff] }
  0x37   :  { %524 = vmatprep.subr.bf16.mxu0 %v712_v0  ;;  %451 = vmatprep.mubr.msk.f32.mxu0 %vm713_vm0, %v714_v1  ;;  %v56_v3 = vld [vmem:[#allocation5 + $0x8] sm:$0xff]  ;;  %v57_v4 = vld [vmem:[#allocation5 + $0x10] sm:$0xff]  ;;  %v58_v6 = vld [vmem:[#allocation5 + $0x18] sm:$0xff]  ;;  %s715_s2 = smov [#allocation8]  }
  0x38   :  { %548 = vmatprep.subr.bf16.mxu1 %v712_v0  ;;  %486 = vmatprep.mubr.msk.f32.mxu1 %vm713_vm0, %v714_v1  ;;  %v525_v5 = vpack.c.bf16 %v56_v3, %v55_v2  ;;  %v528_v7 = vpack.c.bf16 %v58_v6, %v57_v4  ;;  %v59_v8 = vld [vmem:[#allocation5 + $0x20] sm:$0xff]  ;;  %v60_v9 = vld [vmem:[#allocation5 + $0x28] sm:$0xff]  ;;  %v61_v11 = vld [vmem:[#allocation5 + $0x30] sm:$0xff]  ;;  %s353_s21 = sshll.u32 %s715_s2, 4  ;;  %s354_s21 = int_to_ptr.vmem [resolvable:$true] %s353_s21 }
  0x39   :  { %v531_v10 = vpack.c.bf16 %v60_v9, %v59_v8  ;;  %v62_v12 = vld [vmem:[#allocation5 + $0x38] sm:$0xff]  ;;  %v63_v14 = vld [vmem:[#allocation5 + $0x40] sm:$0xff]  ;;  %v64_v15 = vld [vmem:[#allocation5 + $0x48] sm:$0xff]  ;;  %s679_s22 = scalar_lea.vmem %s354_s21, 128  ;;  %p684_p11 = scmp.lt.s32.totalorder %s354_s21, %s354_s21 }
  0x3a   :  { %526 = vmatpush3.bf16.msra.mxu0 %v525_v5  ;;  %v534_v13 = vpack.c.bf16 %v62_v12, %v61_v11  ;;  %v537_v16 = vpack.c.bf16 %v64_v15, %v63_v14  ;;  %v65_v17 = vld [vmem:[#allocation5 + $0x50] sm:$0xff]  ;;  %v66_v18 = vld [vmem:[#allocation5 + $0x58] sm:$0xff]  ;;  %v67_v20 = vld [vmem:[#allocation5 + $0x60] sm:$0xff]  ;;  %p680_p10 = scmp.ne.s32.totalorder %s354_s21, %s679_s22  ;;  %p685_p12 = scmp.lt.s32.totalorder %s679_s22, %s679_s22 }
  0x3b   :  { %527 = vmatprep.subr.bf16.mxu0 %v712_v0  ;;  %v540_v19 = vpack.c.bf16 %v66_v18, %v65_v17  ;;  %v68_v21 = vld [vmem:[#allocation5 + $0x68] sm:$0xff]  ;;  %v69_v23 = vld [vmem:[#allocation5 + $0x70] sm:$0xff]  ;;  %v70_v24 = vld [vmem:[#allocation5 + $0x78] sm:$0xff] }
  0x3c   :  { %v543_v22 = vpack.c.bf16 %v68_v21, %v67_v20  ;;  %v546_v25 = vpack.c.bf16 %v70_v24, %v69_v23  ;;  %v54_v26 = vld [vmem:[#allocation2] sm:$0xff]  ;;  %v154_v27 = vld [vmem:[#allocation5 + $0x80] sm:$0xff]  ;;  %v155_v28 = vld [vmem:[#allocation5 + $0x88] sm:$0xff]  ;;  %p686_p13 = por %p685_p12, %p684_p11 }
  0x3d   :  { %v549_v29 = vpack.c.bf16 %v155_v28, %v154_v27  ;;  %v156_v30 = vld [vmem:[#allocation5 + $0x90] sm:$0xff]  ;;  %v157_v31 = vld [vmem:[#allocation5 + $0x98] sm:$0xff]  ;;  %v158_v33 = vld [vmem:[#allocation5 + $0xa0] sm:$0xff] }
  0x3e   :  { %529 = vmatpush3.bf16.msra.mxu0 %v528_v7  ;;  %v552_v32 = vpack.c.bf16 %v157_v31, %v156_v30  ;;  %v159_v34 = vld [vmem:[#allocation5 + $0xa8] sm:$0xff]  ;;  %v160_v36 = vld [vmem:[#allocation5 + $0xb0] sm:$0xff]  ;;  %v161_v37 = vld [vmem:[#allocation5 + $0xb8] sm:$0xff]  ;;  %p687_p0 = pnand %p686_p13, %p680_p10 }
  0x3f   :  { %530 = vmatprep.subr.bf16.mxu0 %v712_v0  ;;  %550 = vmatpush3.bf16.msra.mxu1 %v549_v29  ;;  %v555_v35 = vpack.c.bf16 %v159_v34, %v158_v33  ;;  %v558_v38 = vpack.c.bf16 %v161_v37, %v160_v36  ;;  %v162_v39 = vld [vmem:[#allocation5 + $0xc0] sm:$0xff]  ;;  %v163_v40 = vld [vmem:[#allocation5 + $0xc8] sm:$0xff]  ;;  %v164_v42 = vld [vmem:[#allocation5 + $0xd0] sm:$0xff] }
  0x40   :  { %551 = vmatprep.subr.bf16.mxu1 %v712_v0  ;;  %v561_v41 = vpack.c.bf16 %v163_v40, %v162_v39  ;;  %v165_v43 = vld [vmem:[#allocation5 + $0xd8] sm:$0xff]  ;;  %v166_v45 = vld [vmem:[#allocation5 + $0xe0] sm:$0xff]  ;;  %v167_v46 = vld [vmem:[#allocation5 + $0xe8] sm:$0xff] }
  0x41   :  { %v564_v44 = vpack.c.bf16 %v165_v43, %v164_v42  ;;  %v567_v47 = vpack.c.bf16 %v167_v46, %v166_v45  ;;  %v168_v48 = vld [vmem:[#allocation5 + $0xf0] sm:$0xff]  ;;  %v169_v49 = vld [vmem:[#allocation5 + $0xf8] sm:$0xff]  ;;  %v363_v51 = vld [vmem:[#allocation7] ss:$0 sm:$0xff] }
  0x42   :  { %532 = vmatpush3.bf16.msra.mxu0 %v531_v10  ;;  %v570_v50 = vpack.c.bf16 %v169_v49, %v168_v48  ;;  %v254_v60 = vld [vmem:[#allocation5 + $0x100] sm:$0xff]  ;;  %v255_v61 = vld [vmem:[#allocation5 + $0x108] sm:$0xff]  ;;  %v256_v63 = vld [vmem:[#allocation5 + $0x110] sm:$0xff] }
  0x43   :  { %533 = vmatprep.subr.bf16.mxu0 %v712_v0  ;;  %553 = vmatpush3.bf16.msra.mxu1 %v552_v32  ;;  %v573_v62 = vpack.c.bf16 %v255_v61, %v254_v60  ;;  %v258_v3 = vld [vmem:[#allocation5 + $0x120] sm:$0xff]  ;;  %v259_v4 = vld [vmem:[#allocation5 + $0x128] sm:$0xff]  ;;  %v260_v6 = vld [vmem:[#allocation5 + $0x130] sm:$0xff] }
  0x44   :  { %554 = vmatprep.subr.bf16.mxu1 %v712_v0  ;;  %v579_v5 = vpack.c.bf16 %v259_v4, %v258_v3  ;;  %v261_v7 = vld [vmem:[#allocation5 + $0x138] sm:$0xff]  ;;  %v262_v9 = vld [vmem:[#allocation5 + $0x140] sm:$0xff]  ;;  %v263_v10 = vld [vmem:[#allocation5 + $0x148] sm:$0xff] }
  0x45   :  { %v582_v8 = vpack.c.bf16 %v261_v7, %v260_v6  ;;  %v585_v11 = vpack.c.bf16 %v263_v10, %v262_v9  ;;  %v264_v12 = vld [vmem:[#allocation5 + $0x150] sm:$0xff]  ;;  %v266_v15 = vld [vmem:[#allocation5 + $0x160] sm:$0xff]  ;;  %v365_v21 = vld [vmem:[#allocation7 + $0x8] ss:$0 sm:$0xff] }
  0x46   :  { %535 = vmatpush3.bf16.msra.mxu0 %v534_v13  ;;  %v265_v13 = vld [vmem:[#allocation5 + $0x158] sm:$0xff]  ;;  %v268_v18 = vld [vmem:[#allocation5 + $0x170] sm:$0xff] }
  0x47   :  { %536 = vmatprep.subr.bf16.mxu0 %v712_v0  ;;  %556 = vmatpush3.bf16.msra.mxu1 %v555_v35  ;;  %v588_v14 = vpack.c.bf16 %v265_v13, %v264_v12  ;;  %v367_v30 = vld [vmem:[#allocation7 + $0x10] ss:$0 sm:$0xff] }
  0x48   :  { %557 = vmatprep.subr.bf16.mxu1 %v712_v0 }
  0x4a   :  { %538 = vmatpush3.bf16.msra.mxu0 %v537_v16  ;;  %v267_v16 = vld [vmem:[#allocation5 + $0x168] sm:$0xff] }
  0x4b   :  { %539 = vmatprep.subr.bf16.mxu0 %v712_v0  ;;  %559 = vmatpush3.bf16.msra.mxu1 %v558_v38  ;;  %v591_v17 = vpack.c.bf16 %v267_v16, %v266_v15 }
  0x4c   :  { %560 = vmatprep.subr.bf16.mxu1 %v712_v0 }
  0x4e   :  { %541 = vmatpush3.bf16.msra.mxu0 %v540_v19  ;;  %v269_v19 = vld [vmem:[#allocation5 + $0x178] sm:$0xff] }
  0x4f   :  { %542 = vmatprep.subr.bf16.mxu0 %v712_v0  ;;  %562 = vmatpush3.bf16.msra.mxu1 %v561_v41  ;;  %v594_v20 = vpack.c.bf16 %v269_v19, %v268_v18 }
  0x50   :  { %563 = vmatprep.subr.bf16.mxu1 %v712_v0 }
  0x52   :  { %544 = vmatpush3.bf16.msra.mxu0 %v543_v22 }
  0x53   :  { %545 = vmatprep.subr.bf16.mxu0 %v712_v0  ;;  %565 = vmatpush3.bf16.msra.mxu1 %v564_v44 }
  0x54   :  { %566 = vmatprep.subr.bf16.mxu1 %v712_v0 }
  0x56   :  { %547 = vmatpush3.bf16.msra.mxu0 %v546_v25 }
  0x57   :  { %572 = vmatprep.subr.bf16.mxu0 %v712_v0  ;;  %568 = vmatpush3.bf16.msra.mxu1 %v567_v47 }
  0x58   :  { %569 = vmatprep.subr.bf16.mxu1 %v712_v0 }
  0x59   :  { %452 = vmatmul.mubr.f32.vlgmr.msra.gmra.mrb[0].mxu0 %v54_v26 }
  0x5a   :  { %521 = vmatprep.mubr.msk.f32.mxu0 %vm713_vm0, %v714_v1  ;;  %574 = vmatpush3.bf16.msra.mxu0 %v573_v62  ;;  %v257_v1 = vld [vmem:[#allocation5 + $0x118] sm:$0xff] }
  0x5b   :  { %571 = vmatpush3.bf16.msra.mxu1 %v570_v50  ;;  %575 = vmatprep.subr.bf16.mxu0 %v712_v0  ;;  %v576_v2 = vpack.c.bf16 %v257_v1, %v256_v63 }
  0x5e   :  { %577 = vmatpush3.bf16.msra.mxu0 %v576_v2 }
  0x5f   :  { %578 = vmatprep.subr.bf16.mxu0 %v712_v0 }
  0x62   :  { %580 = vmatpush3.bf16.msra.mxu0 %v579_v5 }
  0x63   :  { %581 = vmatprep.subr.bf16.mxu0 %v712_v0 }
  0x66   :  { %583 = vmatpush3.bf16.msra.mxu0 %v582_v8 }
  0x67   :  { %584 = vmatprep.subr.bf16.mxu0 %v712_v0 }
  0x6a   :  { %586 = vmatpush3.bf16.msra.mxu0 %v585_v11 }
  0x6b   :  { %587 = vmatprep.subr.bf16.mxu0 %v712_v0 }
  0x6e   :  { %589 = vmatpush3.bf16.msra.mxu0 %v588_v14 }
  0x6f   :  { %590 = vmatprep.subr.bf16.mxu0 %v712_v0 }
  0x72   :  { %592 = vmatpush3.bf16.msra.mxu0 %v591_v17 }
  0x73   :  { %593 = vmatprep.subr.bf16.mxu0 %v712_v0 }
  0x76   :  { %595 = vmatpush3.bf16.msra.mxu0 %v594_v20 }
 0x12c   :  { %v142_v52 = vpop.f32.mrb[0].mxu0 }
 0x12d   :  { %v143_v53 = vadd.f32 %v363_v51, %v142_v52  ;;  %v453_v54 = vpop.f32.mrb[1].mxu0 }
 0x12f   :  { %v364_v55 = vmul.f32 -1.442695, %v143_v53 }
 0x131   :  { %605 = vpow2.f32 %v364_v55 }
 0x13b   :  { %v606_v56 = vpop.eup %605 }
 0x13c   :  { %v149_v57 = vadd.f32 1.0, %v606_v56 }
 0x13e   :  { %607 = vrcp.f32 %v149_v57 }
 0x148   :  { %v608_v58 = vpop.eup %607 }
 0x149   :  { %v152_v59 = vmul.f32 %v608_v58, %v143_v53 }
 0x14b   :  { %487 = vmatmul.mubr.f32.vlgmr.msra.gmra.mrb[0].mxu1 %v152_v59 }
 0x21e   :  { %v242_v22 = vpop.f32.mrb[0].mxu1 }
 0x21f   :  { %v243_v23 = vadd.f32 %v365_v21, %v242_v22  ;;  %v488_v24 = vpop.f32.mrb[1].mxu1 }
 0x221   :  { %v366_v25 = vmul.f32 -1.442695, %v243_v23 }
 0x223   :  { %609 = vpow2.f32 %v366_v25 }
 0x22d   :  { %v610_v26 = vpop.eup %609 }
 0x22e   :  { %v249_v27 = vadd.f32 1.0, %v610_v26 }
 0x230   :  { %611 = vrcp.f32 %v249_v27 }
 0x23a   :  { %v612_v28 = vpop.eup %611 }
 0x23b   :  { %v252_v29 = vmul.f32 %v612_v28, %v243_v23 }
 0x23d   :  { %522 = vmatmul.mubr.f32.vlgmr.msra.gmra.mrb[2].mxu0 %v252_v29 }
 0x310   :  { %v342_v0 = vpop.f32.mrb[2].mxu0 }
 0x311   :  { %v343_v31 = vadd.f32 %v367_v30, %v342_v0  ;;  %v523_v32 = vpop.f32.mrb[3].mxu0 }
 0x313   :  { %346 = vst [vmem:[#allocation8] sm:$0xff] %v343_v31 }
 0x314   :  { %690 = shalt.err (!%p687_p0)
}
 0x315   :  { %s691_s25 = scalar_lea.hbm %s820_s3, 128 }
 0x316   :  { %p692_p1 = scmp.ne.s32.totalorder %s820_s3, %s691_s25  ;;  %p695_p2 = scmp.lt.u32.totalorder %s691_s25, %s820_s3 }
 0x318   :  { %p697_p3 = pnand %p695_p2, %p692_p1 }
 0x31a   :  { %700 = shalt.err (!%p697_p3)
}
 0x31b   :  { %356 = dma.vmem_to_hbm [thread:$0]  %s354_s21, 128, %s820_s3, [#allocation4]  }
 0x31c   :  { %705 = dma.done.wait [#allocation4], 128  }
 0x31d   :  { %706 = vsyncadd [#allocation4], 4294967168 }
 0x31e   :  { %360 = vsyncpa [#allocation3], 1 }
 0x31f   :  { %361 = vsyncpa [#allocation6], 1 }
 0x320   :  { %362 = vsyncpa [#allocation4], 1 }

</bundles_post_ra>
